<compile_context>
chip_gen: v7x
topology: tpu7x:2x2x1
jax: 0.10.0
libtpu: 0.0.40
codegen_flags: <defaults>
</compile_context>

<pallas_src>
import jax
import jax.numpy as jnp
from jax.experimental import pallas as pl
from jax.experimental.pallas import tpu as pltpu


def _round_up(n, m):
    return ((n + m - 1) // m) * m


def _pad2(a, rows, cols):
    pr, pc = rows - a.shape[0], cols - a.shape[1]
    if pr == 0 and pc == 0:
        return a
    return jnp.pad(a, ((0, pr), (0, pc)))


def mlp_kernel(x_ref, w1_ref, b1_ref, w2_ref, b2_ref, o_ref):
    # linear1: [tb, D_in] @ [D_in, H] on the MXU, f32 accumulation.
    h = jnp.dot(x_ref[...], w1_ref[...], preferred_element_type=jnp.float32)
    h = h + b1_ref[...]                      # broadcast [1, H] over the tile
    # sigmoid: exp on the EUP; approx reciprocal also on the EUP (VALU stays free).
    h = pl.reciprocal(1.0 + jnp.exp(-h), approx=True)
    # linear2: cast activation to the (bf16) weight dtype, MXU again, f32 acc.
    y = jnp.dot(h.astype(w2_ref.dtype), w2_ref[...],
                preferred_element_type=jnp.float32)
    o_ref[...] = (y + b2_ref[...]).astype(o_ref.dtype)


def net_forward(x, w1, b1, w2, b2, *, tile_b=128):
    """Fused two-layer MLP with sigmoid activation.

    x  : [B, D_in]   (f32; cast to bf16 internally)
    w1 : [D_in, H]   (PyTorch linear1.weight.T)
    b1 : [1, H]
    w2 : [H, D_out]  (PyTorch linear2.weight.T)
    b2 : [1, D_out]
    returns [B, D_out] float32
    """
    B, D_in = x.shape
    H = w1.shape[1]
    D_out = w2.shape[1]

    # Lane-dense padding: feature dims to multiples of 128.
    D_in_p = _round_up(D_in, 128)
    H_p = _round_up(H, 128)
    D_out_p = _round_up(D_out, 128)

    # Batch tiling: bf16 sublane granularity is 16 rows.
    tb = min(tile_b, _round_up(B, 16))
    B_p = _round_up(B, tb)

    x_p = _pad2(x, B_p, D_in_p).astype(jnp.bfloat16)
    w1_p = _pad2(w1, D_in_p, H_p).astype(jnp.bfloat16)
    w2_p = _pad2(w2, H_p, D_out_p).astype(jnp.bfloat16)
    b1_p = _pad2(b1, 1, H_p).astype(jnp.float32)
    b2_p = _pad2(b2, 1, D_out_p).astype(jnp.float32)

    grid = (B_p // tb,)

    cost = pl.CostEstimate(
        flops=2 * B_p * (D_in_p * H_p + H_p * D_out_p),
        transcendentals=B_p * H_p,
        bytes_accessed=(B_p * D_in_p * 2 + D_in_p * H_p * 2 + H_p * D_out_p * 2
                        + H_p * 4 + D_out_p * 4 + B_p * D_out_p * 4),
    )

    out_p = pl.pallas_call(
        mlp_kernel,
        out_shape=jax.ShapeDtypeStruct((B_p, D_out_p), jnp.float32),
        grid_spec=pl.GridSpec(
            grid=grid,
            in_specs=[
                # x streams tile-by-tile over the batch.
                pl.BlockSpec((tb, D_in_p), lambda i: (i, 0)),
                # Weights / biases: constant block index -> resident in VMEM.
                pl.BlockSpec((D_in_p, H_p), lambda i: (0, 0)),
                pl.BlockSpec((1, H_p), lambda i: (0, 0)),
                pl.BlockSpec((H_p, D_out_p), lambda i: (0, 0)),
                pl.BlockSpec((1, D_out_p), lambda i: (0, 0)),
            ],
            out_specs=pl.BlockSpec((tb, D_out_p), lambda i: (i, 0)),
        ),
        compiler_params=pltpu.CompilerParams(
            # Batch tiles are independent -> shard across both TCs on v7x.
            dimension_semantics=("parallel",),
            vmem_limit_bytes=64 * 1024 * 1024,
        ),
        cost_estimate=cost,
    )(x_p, w1_p, b1_p, w2_p, b2_p)

    return out_p[:B, :D_out]


def reference_forward(x, w1, b1, w2, b2):
    h = x @ w1 + b1
    h = jax.nn.sigmoid(h)
    return h @ w2 + b2


if __name__ == "__main__":
    # Shapes consistent with Net(D_in, H, D_out); batch large enough to
    # exercise the batch grid (2 tiles of 128 rows).
    B, D_in, H, D_out = 256, 128, 64, 32

    key = jax.random.PRNGKey(0)
    kx, kw1, kb1, kw2, kb2 = jax.random.split(key, 5)

    x = jax.random.normal(kx, (B, D_in), dtype=jnp.float32)
    # Deterministic parameter init (roughly matching nn.Linear uniform scale).
    bound1 = 1.0 / (D_in ** 0.5)
    bound2 = 1.0 / (H ** 0.5)
    w1 = jax.random.uniform(kw1, (D_in, H), jnp.float32, -bound1, bound1)
    b1 = jax.random.uniform(kb1, (1, H), jnp.float32, -bound1, bound1)
    w2 = jax.random.uniform(kw2, (H, D_out), jnp.float32, -bound2, bound2)
    b2 = jax.random.uniform(kb2, (1, D_out), jnp.float32, -bound2, bound2)

    out = net_forward(x, w1, b1, w2, b2)
    out = jax.block_until_ready(out)

    ref = reference_forward(x, w1, b1, w2, b2)
    assert out.shape == (B, D_out)
    # bf16 operands with f32 accumulation: relaxed tolerance vs f32 reference.
    max_err = float(jnp.max(jnp.abs(out - ref)))
    assert jnp.allclose(out, ref, atol=3e-2, rtol=3e-2), f"max_err={max_err}"

    print("KERNEL_OK")
</pallas_src>

<mosaic_0001>
module attributes {stable_mosaic.version = 11 : i64} {
  func.func @mlp_kernel(%arg0: i32, %arg1: memref<128x128xbf16, #tpu.memory_space<vmem>>, %arg2: memref<128x128xbf16, #tpu.memory_space<vmem>>, %arg3: memref<1x128xf32, #tpu.memory_space<vmem>>, %arg4: memref<128x128xbf16, #tpu.memory_space<vmem>>, %arg5: memref<1x128xf32, #tpu.memory_space<vmem>>, %arg6: memref<128x128xf32, #tpu.memory_space<vmem>>) attributes {dimension_semantics = [#tpu.dimension_semantics<parallel>], iteration_bounds = array<i64: 2>, scalar_prefetch = 0 : i64, scratch_operands = 0 : i64, tpu.core_type = #tpu.core_type<tc>, window_params = [{transform_indices = @transform_0, window_bounds = array<i64: 128, 128>}, {pipeline_mode = #tpu.pipeline_mode<synchronous>, transform_indices = @transform_1, window_bounds = array<i64: 128, 128>}, {pipeline_mode = #tpu.pipeline_mode<synchronous>, transform_indices = @transform_2, window_bounds = array<i64: 1, 128>}, {pipeline_mode = #tpu.pipeline_mode<synchronous>, transform_indices = @transform_3, window_bounds = array<i64: 128, 128>}, {pipeline_mode = #tpu.pipeline_mode<synchronous>, transform_indices = @transform_4, window_bounds = array<i64: 1, 128>}, {transform_indices = @transform_5, window_bounds = array<i64: 128, 128>}]} {
    %c0 = arith.constant 0 : index
    %c0_0 = arith.constant 0 : index
    %0 = vector.load %arg1[%c0, %c0_0] : memref<128x128xbf16, #tpu.memory_space<vmem>>, vector<128x128xbf16>
    %c0_1 = arith.constant 0 : index
    %c0_2 = arith.constant 0 : index
    %1 = vector.load %arg2[%c0_1, %c0_2] : memref<128x128xbf16, #tpu.memory_space<vmem>>, vector<128x128xbf16>
    %cst = arith.constant dense<0.000000e+00> : vector<128x128xf32>
    %2 = tpu.matmul %0, %1, %cst {dimension_numbers = #tpu.dot_dimension_numbers<[1], [0], [0], [1], [0, 0, 1, 1], [], []>} : vector<128x128xbf16>, vector<128x128xbf16>, vector<128x128xf32> -> vector<128x128xf32>
    %c0_3 = arith.constant 0 : index
    %c0_4 = arith.constant 0 : index
    %3 = vector.load %arg3[%c0_3, %c0_4] : memref<1x128xf32, #tpu.memory_space<vmem>>, vector<1x128xf32>
    %4 = vector.broadcast %3 : vector<1x128xf32> to vector<128x128xf32>
    %5 = arith.addf %2, %4 : vector<128x128xf32>
    %cst_5 = arith.constant 0.000000e+00 : f32
    %6 = vector.broadcast %cst_5 : f32 to vector<128x128xf32>
    %7 = arith.subf %6, %5 : vector<128x128xf32>
    %8 = math.exp %7 : vector<128x128xf32>
    %cst_6 = arith.constant 1.000000e+00 : f32
    %9 = vector.broadcast %cst_6 : f32 to vector<128x128xf32>
    %10 = arith.addf %9, %8 : vector<128x128xf32>
    %11 = tpu.reciprocal %10 {approx = true} : vector<128x128xf32> -> vector<128x128xf32>
    %12 = arith.truncf %11 : vector<128x128xf32> to vector<128x128xbf16>
    %c0_7 = arith.constant 0 : index
    %c0_8 = arith.constant 0 : index
    %13 = vector.load %arg4[%c0_7, %c0_8] : memref<128x128xbf16, #tpu.memory_space<vmem>>, vector<128x128xbf16>
    %cst_9 = arith.constant dense<0.000000e+00> : vector<128x128xf32>
    %14 = tpu.matmul %12, %13, %cst_9 {dimension_numbers = #tpu.dot_dimension_numbers<[1], [0], [0], [1], [0, 0, 1, 1], [], []>} : vector<128x128xbf16>, vector<128x128xbf16>, vector<128x128xf32> -> vector<128x128xf32>
    %c0_10 = arith.constant 0 : index
    %c0_11 = arith.constant 0 : index
    %15 = vector.load %arg5[%c0_10, %c0_11] : memref<1x128xf32, #tpu.memory_space<vmem>>, vector<1x128xf32>
    %16 = vector.broadcast %15 : vector<1x128xf32> to vector<128x128xf32>
    %17 = arith.addf %14, %16 : vector<128x128xf32>
    %c0_12 = arith.constant 0 : index
    %c0_13 = arith.constant 0 : index
    %18 = vector.load %arg6[%c0_12, %c0_13] : memref<128x128xf32, #tpu.memory_space<vmem>>, vector<128x128xf32>
    tpu.vector_store %arg6[%c0_12, %c0_13], %17 {strides = array<i32>} : memref<128x128xf32, #tpu.memory_space<vmem>>, vector<128x128xf32>,
    return
  }
  func.func @transform_0(%arg0: i32) -> (i32, i32) {
    %c0_i32 = arith.constant 0 : i32
    %c0_i32_0 = arith.constant 0 : i32
    return %arg0, %c0_i32 : i32, i32
  }
  func.func @transform_1(%arg0: i32) -> (i32, i32) {
    %c0_i32 = arith.constant 0 : i32
    %c0_i32_0 = arith.constant 0 : i32
    %c0_i32_1 = arith.constant 0 : i32
    return %c0_i32, %c0_i32_0 : i32, i32
  }
  func.func @transform_2(%arg0: i32) -> (i32, i32) {
    %c0_i32 = arith.constant 0 : i32
    %c0_i32_0 = arith.constant 0 : i32
    %c0_i32_1 = arith.constant 0 : i32
    return %c0_i32, %c0_i32_0 : i32, i32
  }
  func.func @transform_3(%arg0: i32) -> (i32, i32) {
    %c0_i32 = arith.constant 0 : i32
    %c0_i32_0 = arith.constant 0 : i32
    %c0_i32_1 = arith.constant 0 : i32
    return %c0_i32, %c0_i32_0 : i32, i32
  }
  func.func @transform_4(%arg0: i32) -> (i32, i32) {
    %c0_i32 = arith.constant 0 : i32
    %c0_i32_0 = arith.constant 0 : i32
    %c0_i32_1 = arith.constant 0 : i32
    return %c0_i32, %c0_i32_0 : i32, i32
  }
  func.func @transform_5(%arg0: i32) -> (i32, i32) {
    %c0_i32 = arith.constant 0 : i32
    %c0_i32_0 = arith.constant 0 : i32
    return %arg0, %c0_i32 : i32, i32
  }
}

</mosaic_0001>

<bundles_post_ra>
// kernel: tpu_custom_call.1
= control target key start
LH: loop header
LB: loop body
LE: loop exit
PB: predicated region body
PF: predicated region fallthrough
CT: control target
= control target key end

     0   :  { %10 = vsyncpa [#allocation3], 0  ;;  %s1846_s0 = inlined_call_operand.hbm [shape: bf16[256,128], index: 0, kind: input, shape index: {}]   ;;  %s1847_s1 = inlined_call_operand.hbm [shape: bf16[128,128], index: 1, kind: input, shape index: {}]   ;;  %s1848_s2 = inlined_call_operand.hbm [shape: f32[1,128], index: 2, kind: input, shape index: {}]   ;;  %s1849_s3 = inlined_call_operand.hbm [shape: bf16[128,128], index: 3, kind: input, shape index: {}]   ;;  %s1850_s4 = inlined_call_operand.hbm [shape: f32[1,128], index: 4, kind: input, shape index: {}]   ;;  %s1851_s5 = inlined_call_operand.hbm [shape: f32[256,128], index: 5, kind: output, shape index: {}]  }
   0x1   :  { %12 = vsyncpa [#allocation3 + $0x1], 0 }
   0x2   :  { %13 = vsyncpa [#allocation6], 0 }
   0x3   :  { %14 = vsyncpa [#allocation9], 0 }
   0x4   :  { %15 = vsyncpa [#allocation4], 0 }
   0x5   :  { %17 = vsyncpa [#allocation4 + $0x1], 0  ;;  %s1512_s18 = smov 0   ;;  %s1514_s19 = smov 0  }
   0x6   :  { %s1516_s20 = smov 0   ;;  %s1518_s21 = smov 0  }
   0x7 LB: > { %s1533_s22 = sadd.s32 4294967295, %s1470_s21   ;;  %s929_s23 = sadd.s32 4294967294, %s1470_s21   ;;  %s1470_s21 = sphi %s1518_s21, %s1874_s21   ;;  %s1466_s20 = sphi %s1516_s20, %s1873_s20   ;;  %s1462_s19 = sphi %s1514_s19, %s1872_s19   ;;  %s1458_s18 = sphi %s1512_s18, %s1871_s18  }
   0x8   : > { %p43_p0 = scmp.ne.s32.totalorder %s1462_s19, %s1458_s18  ;;  %p1852_p1 = scmp.eq.s32.totalorder %s1533_s22, 0 }
   0x9   : > { %p157_p3 = scmp.eq.s32.totalorder %s929_s23, 1  ;;  %p930_p5 = scmp.ge.s32.totalorder %s1470_s21, 1 }
   0xa   : > { %p1542_p4 = por %p1852_p1, %p43_p0  ;;  %p164_p7 = scmp.lt.s32.totalorder %s1470_s21, 3 }
   0xb   : > { %p1547_p6 = por %p157_p3, %p43_p0  ;;  %s1472_s27 = smov [#allocation5]  }
   0xc   : > { %s1855_s24 = scalar_select %p1542_p4, 1, 0 }
   0xd   : > { %s1856_s25 = scalar_select %p1547_p6, 1, 0 }
   0xe   : > { %p1552_p8 = pnand %p930_p5, %p164_p7  ;;  %s176_s28 = sshll.u32 %s1472_s27, 4  ;;  %s1556_s28 = int_to_ptr.vmem [resolvable:$true] %s176_s28 }
   0xf   : > { %s1473_s30 = smov [#allocation8]   ;;  %s1474_s7 = smov [#allocation7]  }
  0x10   : > { %s1857_s26 = scalar_select %p1552_p8, 1, 0 }
  0x11   : > { %p1095_p9 = pneg %p1552_p8  ;;  %s200_s6 = sshll.u32 %s1473_s30, 4  ;;  %s1567_s6 = int_to_ptr.vmem [resolvable:$true] %s200_s6 }
  0x12   : > { %s1569_s8 = sshll.u32 %s1474_s7, 4  ;;  %s1254_s11 = scalar_lea.hbm %s1847_s1, 1024  ;;  %s191_s8 = int_to_ptr.vmem [resolvable:$true] %s1569_s8 }
  0x13   : > { %p1563_p11 = pnand %p1095_p9, %p1852_p1  ;;  %p1255_p12 = scmp.ne.s32.totalorder %s1847_s1, %s1254_s11 }
  0x14   : > { %p1261_p5 = scmp.lt.u32.totalorder %s1254_s11, %s1847_s1 }
  0x15   : > { %p1579_p13 = pneg %p1563_p11 }
  0x17   : > { %p1257_p0 = pnand %p1579_p13, %p1255_p12 }
  0x19   : > { %p1258_p3 = pneg %p1257_p0 }
  0x1b   : > { %p1263_p7 = pnand %p1261_p5, %p1258_p3 }
  0x1d   : > { %1266 = shalt.err (!%p1263_p7)
}
  0x1e   : > { %s1267_s17 = scalar_lea.vmem %s1556_s28, 1024  ;;  %p1275_p2 = scmp.lt.s32.totalorder %s1556_s28, %s1556_s28 }
  0x1f   : > { %p1268_p9 = scmp.ne.s32.totalorder %s1556_s28, %s1267_s17  ;;  %p1276_p6 = scmp.lt.s32.totalorder %s1267_s17, %s1267_s17 }
  0x21   : > { %p1270_p10 = pnand %p1268_p9, %p1579_p13  ;;  %p1277_p12 = por %p1276_p6, %p1275_p2 }
  0x23   : > { %p1271_p1 = pneg %p1270_p10 }
  0x25   : > { %p1278_p0 = pnand %p1277_p12, %p1271_p1 }
  0x27   : > { %1281 = shalt.err (!%p1278_p0)
}
  0x28   : > { %s1475_s23 = smov 64   ;;  %s1476_s27 = smov 4  }
  0x29   : > { %1098 = dma.hbm_to_vmem [thread:$0]  (!%p1563_p11), %s1847_s1, 1024, %s1556_s28, [#allocation6], %s1475_s23, %s1475_s23, %s1476_s27  }
  0x2a   : > { %s1282_s11 = scalar_lea.hbm %s1849_s3, 1024 }
  0x2b   : > { %p1283_p1 = scmp.ne.s32.totalorder %s1849_s3, %s1282_s11  ;;  %p1289_p10 = scmp.lt.u32.totalorder %s1282_s11, %s1849_s3 }
  0x2d   : > { %p1285_p2 = pnand %p1283_p1, %p1579_p13 }
  0x2f   : > { %p1286_p6 = pneg %p1285_p2 }
  0x31   : > { %p1291_p3 = pnand %p1289_p10, %p1286_p6 }
  0x33   : > { %1294 = shalt.err (!%p1291_p3)
}
  0x34   : > { %s1295_s28 = scalar_lea.vmem %s1567_s6, 1024  ;;  %p1303_p12 = scmp.lt.s32.totalorder %s1567_s6, %s1567_s6 }
  0x35   : > { %p1296_p5 = scmp.ne.s32.totalorder %s1567_s6, %s1295_s28  ;;  %p1304_p0 = scmp.lt.s32.totalorder %s1295_s28, %s1295_s28 }
  0x37   : > { %p1298_p7 = pnand %p1296_p5, %p1579_p13  ;;  %p1305_p1 = por %p1304_p0, %p1303_p12 }
  0x39   : > { %p1299_p9 = pneg %p1298_p7 }
  0x3b   : > { %p1306_p2 = pnand %p1305_p1, %p1299_p9 }
  0x3d   : > { %1309 = shalt.err (!%p1306_p2)
}
  0x3e   : > { %1104 = dma.hbm_to_vmem [thread:$0]  (!%p1563_p11), %s1849_s3, 1024, %s1567_s6, [#allocation9], %s1475_s23, %s1475_s23, %s1476_s27  }
  0x3f   : > { %s1310_s10 = scalar_lea.hbm %s1848_s2, 16 }
  0x40   : > { %p1311_p6 = scmp.ne.s32.totalorder %s1848_s2, %s1310_s10  ;;  %p1317_p5 = scmp.lt.u32.totalorder %s1310_s10, %s1848_s2 }
  0x42   : > { %p1313_p10 = pnand %p1311_p6, %p1579_p13 }
  0x44   : > { %p1314_p3 = pneg %p1313_p10 }
  0x46   : > { %p1319_p7 = pnand %p1317_p5, %p1314_p3 }
  0x48   : > { %1322 = shalt.err (!%p1319_p7)
}
  0x49   : > { %s1323_s16 = scalar_lea.vmem %s191_s8, 16  ;;  %s1330_s6 = scalar_lea.vmem %s191_s8, 32 }
  0x4a   : > { %p1324_p9 = scmp.ne.s32.totalorder %s191_s8, %s1323_s16  ;;  %p1331_p1 = scmp.lt.s32.totalorder %s191_s8, %s191_s8 }
  0x4b   : > { %p1332_p2 = scmp.lt.s32.totalorder %s1330_s6, %s1323_s16 }
  0x4c   : > { %p1326_p12 = pnand %p1324_p9, %p1579_p13 }
  0x4d   : > { %p1333_p4 = por %p1332_p2, %p1331_p1 }
  0x4e   : > { %p1327_p0 = pneg %p1326_p12 }
  0x50   : > { %p1334_p8 = pnand %p1333_p4, %p1327_p0 }
  0x52   : > { %1337 = shalt.err (!%p1334_p8)
}
  0x53   : > { %1101 = dma.hbm_to_vmem [thread:$0]  (!%p1563_p11), %s1848_s2, 16, %s191_s8, [#allocation6]  }
  0x54   : > { %s1477_s30 = smov [#allocation10]   ;;  %s1338_s11 = scalar_lea.hbm %s1850_s4, 16 }
  0x55   : > { %s214_s7 = sshll.u32 %s1477_s30, 4  ;;  %p1339_p6 = scmp.ne.s32.totalorder %s1850_s4, %s1338_s11  ;;  %s215_s7 = int_to_ptr.vmem [resolvable:$true] %s214_s7 }
  0x56   : > { %p1345_p10 = scmp.lt.u32.totalorder %s1338_s11, %s1850_s4 }
  0x57   : > { %p1341_p4 = pnand %p1339_p6, %p1579_p13 }
  0x59   : > { %p1342_p8 = pneg %p1341_p4 }
  0x5b   : > { %p1347_p3 = pnand %p1345_p10, %p1342_p8 }
  0x5d   : > { %1350 = shalt.err (!%p1347_p3)
}
  0x5e   : > { %s1351_s8 = scalar_lea.vmem %s215_s7, 16  ;;  %s1358_s6 = scalar_lea.vmem %s215_s7, 32 }
  0x5f   : > { %p1352_p5 = scmp.ne.s32.totalorder %s215_s7, %s1351_s8  ;;  %p1359_p12 = scmp.lt.s32.totalorder %s215_s7, %s215_s7 }
  0x60   : > { %p1360_p0 = scmp.lt.s32.totalorder %s1358_s6, %s1351_s8 }
  0x61   : > { %p1354_p7 = pnand %p1352_p5, %p1579_p13 }
  0x62   : > { %p1361_p1 = por %p1360_p0, %p1359_p12 }
  0x63   : > { %p1355_p9 = pneg %p1354_p7 }
  0x65   : > { %p1362_p2 = pnand %p1361_p1, %p1355_p9 }
  0x67   : > { %1365 = shalt.err (!%p1362_p2)
}
  0x68   : > { %1107 = dma.hbm_to_vmem [thread:$0]  (!%p1563_p11), %s1850_s4, 16, %s215_s7, [#allocation9]  }
  0x69   : > { %s1667_s14 = sadd.s32 1, %s1470_s21   ;;  %s30_s30 = sadd.s32 1, %s1466_s20 }
  0x6a   : > { %s27_s29 = ssub.s32 %s1470_s21, %s1667_s14  ;;  %p37_p13 = scmp.ne.s32.totalorder %s1466_s20, %s1462_s19 }
  0x6b   : > { %p28_p6 = scmp.eq.s32.totalorder %s27_s29, 0  ;;  %p38_p4 = scmp.eq.s32.totalorder %s1470_s21, 0 }
  0x6c   : > { %p1860_p8 = scmp.eq.s32.totalorder %s1533_s22, 1  ;;  %p1120_p3 = scmp.lt.s32.totalorder %s1470_s21, 2 }
  0x6d   : > { %s1683_s10 = scalar_select %p28_p6, %s1466_s20, %s30_s30  }
  0x6e   : > { %p1677_p10 = por %p1860_p8, %p37_p13  ;;  %p39_p5 = por %p38_p4, %p37_p13 }
  0x6f   : > { %s225_s11 = sand.u32 1, %s1466_s20   ;;  %s977_s7 = sshll.u32 %s1470_s21, 10 }
  0x70   : > { %s936_s12 = sshll.u32 %s225_s11, 6  ;;  %s1690_s16 = scalar_lea.hbm %s1846_s0, %s977_s7 }
  0x71   : > { %s229_s8 = scalar_lea.vmem [#allocation2], %s936_s12  ;;  %p1694_p11 = pnand %p1120_p3, %p39_p5 }
  0x72   : > { %s236_s6 = sshll.u32 %s229_s8, 4  ;;  %s1698_s17 = scalar_lea.sflag [#allocation3], %s225_s11  ;;  %s1692_s6 = int_to_ptr.vmem [resolvable:$true] %s236_s6 }
  0x73   : > { %s1366_s30 = scalar_lea.hbm %s1690_s16, 1024  ;;  %p1368_p9 = pneg %p1694_p11 }
  0x74   : > { %p1367_p7 = scmp.ne.s32.totalorder %s1690_s16, %s1366_s30  ;;  %s1371_s7 = scalar_lea.hbm %s1846_s0, 2048 }
  0x75   : > { %p1372_p1 = scmp.lt.u32.totalorder %s1690_s16, %s1846_s0  ;;  %p1373_p2 = scmp.lt.u32.totalorder %s1371_s7, %s1366_s30 }
  0x76   : > { %p1369_p12 = pnand %p1368_p9, %p1367_p7  ;;  %p1375_p6 = scmp.lt.u32.totalorder %s1366_s30, %s1690_s16 }
  0x77   : > { %p1374_p13 = por %p1373_p2, %p1372_p1 }
  0x78   : > { %p1370_p0 = pneg %p1369_p12 }
  0x79   : > { %p1376_p4 = por %p1375_p6, %p1374_p13 }
  0x7b   : > { %p1377_p8 = pnand %p1376_p4, %p1370_p0 }
  0x7d   : > { %1380 = shalt.err (!%p1377_p8)
}
  0x7e   : > { %s1381_s11 = scalar_lea.vmem %s1692_s6, 1024  ;;  %s1478_s8 = smov [#allocation2]  }
  0x7f   : > { %p1382_p3 = scmp.ne.s32.totalorder %s1692_s6, %s1381_s11  ;;  %s1386_s29 = sshll.u32 %s1478_s8, 4  ;;  %s1387_s29 = int_to_ptr.vmem [resolvable:$false] %s1386_s29 }
  0x80   : > { %s1388_s12 = scalar_lea.vmem %s1387_s29, 2048  ;;  %p1389_p12 = scmp.lt.s32.totalorder %s1692_s6, %s1387_s29 }
  0x81   : > { %p1384_p5 = pnand %p1382_p3, %p1368_p9  ;;  %p1390_p1 = scmp.lt.s32.totalorder %s1388_s12, %s1381_s11 }
  0x83   : > { %p1385_p7 = pneg %p1384_p5  ;;  %p1391_p2 = por %p1390_p1, %p1389_p12 }
  0x85   : > { %p1392_p13 = pnand %p1391_p2, %p1385_p7 }
  0x87   : > { %1395 = shalt.err (!%p1392_p13)
}
  0x88   : > { %1111 = dma.hbm_to_vmem [thread:$0]  (!%p1694_p11), %s1690_s16, 1024, %s1692_s6, %s1698_s17, %s1475_s23, %s1475_s23, %s1476_s27  }
  0x89   : > { %p1863_p9 = scmp.ne.s32.totalorder %s1857_s26, 0 }
  0x8a   : > { %s1732_s30 = sand.u32 (!%p1863_p9), 1, %s1462_s19   ;;  %p1864_p0 = scmp.ne.s32.totalorder (!%p1863_p9), %s1855_s24, 0 }
  0x8b   : > { %248 = sbr.rel (%p1863_p9) target bundleno = 692 (0x2b4), region = 40  ;;  %s940_s7 = sshll.u32 (!%p1863_p9), %s1732_s30, 6 }
  0x8c   : > { %s251_s13 = scalar_lea.sflag (!%p1863_p9), [#allocation3], %s1732_s30  ;;  %s1736_s15 = scalar_lea.vmem (!%p1863_p9), [#allocation2], %s940_s7 }
  0x92   : > { %1441 = dma.done.wait (%p1864_p0), %s251_s13, 1024  }
  0x93   : > { %1443 = vsyncadd (%p1864_p0), %s251_s13, 4294966272  ;;  %p1865_p11 = scmp.eq.s32.totalorder %s1533_s22, 0 }
  0x95   : > { %1445 = dma.done.wait (%p1865_p11), [#allocation6], 1040   ;;  %p1866_p6 = pmov %p1865_p11 }
  0x97   : > { %1447 = vsyncadd (%p1866_p6), [#allocation6], 4294966256  ;;  %p1867_p4 = pmov %p1866_p6 }
  0x99   : > { %1449 = dma.done.wait (%p1867_p4), [#allocation9], 1040   ;;  %p1868_p8 = pmov %p1867_p4 }
  0x9a   : > { %v1166_v0 = vld [vmem:[#allocation5] sm:$0xff]   ;;  %v1167_v1 = vld [vmem:[#allocation5 + $0x8] sm:$0xff]   ;;  %v1168_v2 = vld [vmem:[#allocation5 + $0x10] sm:$0xff]   ;;  %s945_s24 = sshll.u32 %s1732_s30, 7  ;;  %s978_s23 = sshll.u32 %s1533_s22, 11 }
  0x9b   : > { %1451 = vsyncadd (%p1868_p8), [#allocation9], 4294966256  ;;  %1011 = vmatprep.subr.bf16.mxu0 %v1166_v0  ;;  %v1169_v3 = vld [vmem:[#allocation5 + $0x18] sm:$0xff]   ;;  %v1174_v4 = vld [vmem:[%s1736_s15] sm:$0xff]   ;;  %s1777_s26 = scalar_lea.vmem [#allocation11], %s945_s24  ;;  %s1797_s28 = scalar_lea.hbm %s1851_s5, %s978_s23 }
  0x9c   : > { %1012 = vmatpush3.bf16.msra.mxu0 %v1166_v0  ;;  %1027 = vmatprep.mubr.bf16.mxu0 %v1174_v4  ;;  %v1170_v5 = vld [vmem:[#allocation5 + $0x20] sm:$0xff]   ;;  %v1171_v6 = vld [vmem:[#allocation5 + $0x28] sm:$0xff]   ;;  %v1172_v7 = vld [vmem:[#allocation5 + $0x30] sm:$0xff]   ;;  %s818_s27 = sshll.u32 %s1777_s26, 4  ;;  %s805_s22 = scalar_lea.sflag [#allocation4], %s1732_s30  ;;  %s1799_s27 = int_to_ptr.vmem [resolvable:$true] %s818_s27 }
  0x9d   : > { %1013 = vmatprep.subr.bf16.mxu0 %v1167_v1  ;;  %v1173_v8 = vld [vmem:[#allocation5 + $0x38] sm:$0xff]   ;;  %v1175_v9 = vld [vmem:[%s1736_s15 + $0x8] sm:$0xff]   ;;  %v1176_v10 = vld [vmem:[%s1736_s15 + $0x10] sm:$0xff]   ;;  %s1396_s17 = scalar_lea.vmem %s1799_s27, 2048  ;;  %s1479_s11 = smov [#allocation11]  }
  0x9e   : > { %v1177_v11 = vld [vmem:[%s1736_s15 + $0x18] sm:$0xff]   ;;  %v1178_v12 = vld [vmem:[%s1736_s15 + $0x20] sm:$0xff]   ;;  %v1179_v13 = vld [vmem:[%s1736_s15 + $0x28] sm:$0xff]   ;;  %p1397_p3 = scmp.ne.s32.totalorder %s1799_s27, %s1396_s17  ;;  %s1400_s8 = sshll.u32 %s1479_s11, 4  ;;  %s1401_s8 = int_to_ptr.vmem [resolvable:$false] %s1400_s8 }
  0x9f   : > { %v1180_v14 = vld [vmem:[%s1736_s15 + $0x30] sm:$0xff]   ;;  %v1181_v15 = vld [vmem:[%s1736_s15 + $0x38] sm:$0xff]   ;;  %v1182_v16 = vld [vmem:[#allocation8] sm:$0xff]   ;;  %s1402_s29 = scalar_lea.vmem %s1401_s8, 4096  ;;  %p1403_p12 = scmp.lt.s32.totalorder %s1799_s27, %s1401_s8 }
  0xa0   : > { %1014 = vmatpush3.bf16.msra.mxu0 %v1167_v1  ;;  %1043 = vmatprep.subr.bf16.mxu1 %v1182_v16  ;;  %v1183_v17 = vld [vmem:[#allocation8 + $0x8] sm:$0xff]   ;;  %v1184_v18 = vld [vmem:[#allocation8 + $0x10] sm:$0xff]   ;;  %v1185_v19 = vld [vmem:[#allocation8 + $0x18] sm:$0xff]   ;;  %p1398_p5 = pnand %p1397_p3, %p1677_p10  ;;  %p1404_p1 = scmp.lt.s32.totalorder %s1402_s29, %s1396_s17 }
  0xa1   : > { %1015 = vmatprep.subr.bf16.mxu0 %v1168_v2  ;;  %1044 = vmatpush3.bf16.msra.mxu1 %v1182_v16  ;;  %v1186_v20 = vld [vmem:[#allocation8 + $0x20] sm:$0xff]   ;;  %v1187_v21 = vld [vmem:[#allocation8 + $0x28] sm:$0xff]   ;;  %v1188_v22 = vld [vmem:[#allocation8 + $0x30] sm:$0xff]  }
  0xa2   : > { %1045 = vmatprep.subr.bf16.mxu1 %v1183_v17  ;;  %v1189_v23 = vld [vmem:[#allocation8 + $0x38] sm:$0xff]   ;;  %p1399_p7 = pneg %p1398_p5  ;;  %p1405_p2 = por %p1404_p1, %p1403_p12 }
  0xa3   : > { %v1758_v24 = vld [vmem:[#allocation7] ss:$0 sm:$0xff] }
  0xa4   : > { %1016 = vmatpush3.bf16.msra.mxu0 %v1168_v2  ;;  %p1406_p13 = pnand %p1405_p2, %p1399_p7 }
  0xa5   : > { %1017 = vmatprep.subr.bf16.mxu0 %v1169_v3  ;;  %1046 = vmatpush3.bf16.msra.mxu1 %v1183_v17 }
  0xa6   : > { %1047 = vmatprep.subr.bf16.mxu1 %v1184_v18 }
  0xa8   : > { %1018 = vmatpush3.bf16.msra.mxu0 %v1169_v3 }
  0xa9   : > { %1019 = vmatprep.subr.bf16.mxu0 %v1170_v5  ;;  %1048 = vmatpush3.bf16.msra.mxu1 %v1184_v18 }
  0xaa   : > { %1049 = vmatprep.subr.bf16.mxu1 %v1185_v19 }
  0xac   : > { %1020 = vmatpush3.bf16.msra.mxu0 %v1170_v5 }
  0xad   : > { %1021 = vmatprep.subr.bf16.mxu0 %v1171_v6  ;;  %1050 = vmatpush3.bf16.msra.mxu1 %v1185_v19 }
  0xae   : > { %1051 = vmatprep.subr.bf16.mxu1 %v1186_v20 }
  0xb0   : > { %1022 = vmatpush3.bf16.msra.mxu0 %v1171_v6 }
  0xb1   : > { %1023 = vmatprep.subr.bf16.mxu0 %v1172_v7  ;;  %1052 = vmatpush3.bf16.msra.mxu1 %v1186_v20 }
  0xb2   : > { %1053 = vmatprep.subr.bf16.mxu1 %v1187_v21 }
  0xb4   : > { %1024 = vmatpush3.bf16.msra.mxu0 %v1172_v7 }
  0xb5   : > { %1025 = vmatprep.subr.bf16.mxu0 %v1173_v8  ;;  %1054 = vmatpush3.bf16.msra.mxu1 %v1187_v21 }
  0xb6   : > { %1055 = vmatprep.subr.bf16.mxu1 %v1188_v22 }
  0xb8   : > { %1026 = vmatpush3.bf16.msra.mxu0 %v1173_v8 }
  0xb9   : > { %1056 = vmatpush3.bf16.msra.mxu1 %v1188_v22 }
  0xba   : > { %1057 = vmatprep.subr.bf16.mxu1 %v1189_v23 }
  0xbb   : > { %1028 = vmatmul.mubr.bf16.vlgmr.msra.gmra.mrb[0].mxu0 %v1175_v9 }
  0xbc   : > { %1031 = vmatprep.mubr.bf16.mxu0 %v1176_v10 }
  0xbd   : > { %1058 = vmatpush3.bf16.msra.mxu1 %v1189_v23 }
  0xc3   : > { %1032 = vmatmul.mubr.bf16.gmra.mrb[4].mxu0 %v1177_v11 }
  0xc4   : > { %1035 = vmatprep.mubr.bf16.mxu0 %v1178_v12 }
  0xcb   : > { %1036 = vmatmul.mubr.bf16.gmra.mrb[8].mxu0 %v1179_v13 }
  0xcc   : > { %1039 = vmatprep.mubr.bf16.mxu0 %v1180_v14 }
  0xd3   : > { %1040 = vmatmul.mubr.bf16.gmra.mrb[12].mxu0 %v1181_v15 }
 0x18e   : > { %v1029_v25 = vpop.f32.mrb[0].mxu0 }
 0x18f   : > { %v478_v26 = vadd.f32 %v1029_v25, %v1758_v24  ;;  %v469_v27 = vpop.f32.mrb[1].mxu0 }
 0x190   : > { %v470_v28 = vadd.f32 %v1758_v24, %v469_v27  ;;  %v1030_v29 = vpop.f32.mrb[2].mxu0 }
 0x191   : > { %v534_v30 = vsub.f32 0.0, %v478_v26  ;;  %v481_v31 = vadd.f32 %v1030_v29, %v1758_v24  ;;  %v472_v32 = vpop.f32.mrb[3].mxu0 }
 0x192   : > { %v532_v33 = vsub.f32 0.0, %v470_v28  ;;  %v473_v34 = vadd.f32 %v1758_v24, %v472_v32 }
 0x193   : > { %v552_v35 = vmul.f32 1.442695, %v534_v30  ;;  %v535_v36 = vsub.f32 0.0, %v481_v31 }
 0x194   : > { %v548_v37 = vmul.f32 1.442695, %v532_v33  ;;  %v533_v38 = vsub.f32 0.0, %v473_v34 }
 0x195   : > { %1190 = vpow2.f32 %v552_v35  ;;  %v554_v39 = vmul.f32 1.442695, %v535_v36 }
 0x196   : > { %1192 = vpow2.f32 %v548_v37  ;;  %v550_v40 = vmul.f32 1.442695, %v533_v38  ;;  %v1033_v41 = vpop.f32.mrb[4].mxu0 }
 0x197   : > { %1194 = vpow2.f32 %v554_v39  ;;  %v494_v42 = vadd.f32 %v1033_v41, %v1758_v24  ;;  %v485_v43 = vpop.f32.mrb[5].mxu0 }
 0x198   : > { %1196 = vpow2.f32 %v550_v40  ;;  %v486_v44 = vadd.f32 %v1758_v24, %v485_v43  ;;  %v1034_v45 = vpop.f32.mrb[6].mxu0 }
 0x199   : > { %v538_v46 = vsub.f32 0.0, %v494_v42  ;;  %v497_v47 = vadd.f32 %v1034_v45, %v1758_v24  ;;  %v488_v48 = vpop.f32.mrb[7].mxu0 }
 0x19a   : > { %v536_v49 = vsub.f32 0.0, %v486_v44  ;;  %v489_v50 = vadd.f32 %v1758_v24, %v488_v48 }
 0x19b   : > { %v560_v51 = vmul.f32 1.442695, %v538_v46  ;;  %v539_v52 = vsub.f32 0.0, %v497_v47 }
 0x19c   : > { %v556_v53 = vmul.f32 1.442695, %v536_v49  ;;  %v537_v54 = vsub.f32 0.0, %v489_v50 }
 0x19d   : > { %1198 = vpow2.f32 %v560_v51  ;;  %v562_v55 = vmul.f32 1.442695, %v539_v52 }
 0x19e   : > { %1200 = vpow2.f32 %v556_v53  ;;  %v558_v56 = vmul.f32 1.442695, %v537_v54  ;;  %v1037_v57 = vpop.f32.mrb[8].mxu0 }
 0x19f   : > { %v1191_v58 = vpop.eup %1190  ;;  %1202 = vpow2.f32 %v562_v55  ;;  %v510_v59 = vadd.f32 %v1037_v57, %v1758_v24  ;;  %v501_v60 = vpop.f32.mrb[9].mxu0 }
 0x1a0   : > { %v1193_v61 = vpop.eup %1192  ;;  %v582_v62 = vadd.f32 1.0, %v1191_v58  ;;  %1204 = vpow2.f32 %v558_v56  ;;  %v502_v63 = vadd.f32 %v1758_v24, %v501_v60  ;;  %v1038_v0 = vpop.f32.mrb[10].mxu0 }
 0x1a1   : > { %v1195_v1 = vpop.eup %1194  ;;  %v580_v2 = vadd.f32 1.0, %v1193_v61  ;;  %v542_v3 = vsub.f32 0.0, %v510_v59  ;;  %v513_v4 = vadd.f32 %v1038_v0, %v1758_v24  ;;  %v504_v5 = vpop.f32.mrb[11].mxu0 }
 0x1a2   : > { %v1197_v6 = vpop.eup %1196  ;;  %1206 = vrcp.f32 %v582_v62  ;;  %v583_v7 = vadd.f32 1.0, %v1195_v1  ;;  %v540_v8 = vsub.f32 0.0, %v502_v63  ;;  %v505_v9 = vadd.f32 %v1758_v24, %v504_v5 }
 0x1a3   : > { %1208 = vrcp.f32 %v580_v2  ;;  %v581_v10 = vadd.f32 1.0, %v1197_v6  ;;  %v568_v11 = vmul.f32 1.442695, %v542_v3  ;;  %v543_v12 = vsub.f32 0.0, %v513_v4 }
 0x1a4   : > { %1210 = vrcp.f32 %v583_v7  ;;  %v564_v13 = vmul.f32 1.442695, %v540_v8  ;;  %v541_v14 = vsub.f32 0.0, %v505_v9 }
 0x1a5   : > { %1212 = vrcp.f32 %v581_v10  ;;  %v570_v15 = vmul.f32 1.442695, %v543_v12 }
 0x1a6   : > { %1214 = vpow2.f32 %v568_v11  ;;  %v566_v16 = vmul.f32 1.442695, %v541_v14  ;;  %v1041_v17 = vpop.f32.mrb[12].mxu0 }
 0x1a7   : > { %v1199_v18 = vpop.eup %1198  ;;  %1216 = vpow2.f32 %v564_v13  ;;  %v526_v19 = vadd.f32 %v1041_v17, %v1758_v24  ;;  %v517_v20 = vpop.f32.mrb[13].mxu0  ;;  %v963_v17 = vld [vmem:[#allocation10] ss:$0 sm:$0xff] }
 0x1a8   : > { %v1201_v21 = vpop.eup %1200  ;;  %v586_v22 = vadd.f32 1.0, %v1199_v18  ;;  %1218 = vpow2.f32 %v570_v15  ;;  %v518_v23 = vadd.f32 %v1758_v24, %v517_v20  ;;  %v1042_v25 = vpop.f32.mrb[14].mxu0 }
 0x1a9   : > { %v1203_v26 = vpop.eup %1202  ;;  %v584_v27 = vadd.f32 1.0, %v1201_v21  ;;  %1220 = vpow2.f32 %v566_v16  ;;  %v546_v28 = vsub.f32 0.0, %v526_v19  ;;  %v529_v29 = vadd.f32 %v1042_v25, %v1758_v24  ;;  %v520_v30 = vpop.f32.mrb[15].mxu0 }
 0x1aa   : > { %v1205_v31 = vpop.eup %1204  ;;  %1222 = vrcp.f32 %v586_v22  ;;  %v587_v32 = vadd.f32 1.0, %v1203_v26  ;;  %v544_v33 = vsub.f32 0.0, %v518_v23  ;;  %v521_v34 = vadd.f32 %v1758_v24, %v520_v30 }
 0x1ab   : > { %1224 = vrcp.f32 %v584_v27  ;;  %v585_v35 = vadd.f32 1.0, %v1205_v31  ;;  %v576_v36 = vmul.f32 1.442695, %v546_v28  ;;  %v547_v37 = vsub.f32 0.0, %v529_v29 }
 0x1ac   : > { %v1207_v38 = vpop.eup %1206  ;;  %1226 = vrcp.f32 %v587_v32  ;;  %v572_v39 = vmul.f32 1.442695, %v544_v33  ;;  %v545_v40 = vsub.f32 0.0, %v521_v34 }
 0x1ad   : > { %v1209_v41 = vpop.eup %1208  ;;  %1228 = vrcp.f32 %v585_v35  ;;  %v578_v42 = vmul.f32 1.442695, %v547_v37 }
 0x1ae   : > { %v1211_v43 = vpop.eup %1210  ;;  %1230 = vpow2.f32 %v576_v36  ;;  %v574_v44 = vmul.f32 1.442695, %v545_v40 }
 0x1af   : > { %v1213_v45 = vpop.eup %1212  ;;  %1232 = vpow2.f32 %v572_v39  ;;  %v613_v46 = vpack.c.bf16 %v1211_v43, %v1207_v38 }
 0x1b0   : > { %v1215_v47 = vpop.eup %1214  ;;  %1234 = vpow2.f32 %v578_v42  ;;  %v612_v24 = vpack.c.bf16 %v1213_v45, %v1209_v41 }
 0x1b1   : > { %v1217_v48 = vpop.eup %1216  ;;  %v590_v49 = vadd.f32 1.0, %v1215_v47  ;;  %1236 = vpow2.f32 %v574_v44 }
 0x1b2   : > { %v1219_v50 = vpop.eup %1218  ;;  %v588_v51 = vadd.f32 1.0, %v1217_v48  ;;  %1059 = vmatprep.mubr.bf16.mxu1 %v612_v24 }
 0x1b3   : > { %v1221_v52 = vpop.eup %1220  ;;  %1238 = vrcp.f32 %v590_v49  ;;  %v591_v53 = vadd.f32 1.0, %v1219_v50  ;;  %1060 = vmatmul.mubr.bf16.vlgmr.msra.gmra.mrb[0].mxu1 %v613_v46 }
 0x1b4   : > { %v1223_v54 = vpop.eup %1222  ;;  %1240 = vrcp.f32 %v588_v51  ;;  %v589_v55 = vadd.f32 1.0, %v1221_v52 }
 0x1b5   : > { %v1225_v56 = vpop.eup %1224  ;;  %1242 = vrcp.f32 %v591_v53 }
 0x1b6   : > { %v1227_v57 = vpop.eup %1226  ;;  %1244 = vrcp.f32 %v589_v55 }
 0x1b7   : > { %v1229_v58 = vpop.eup %1228  ;;  %v615_v59 = vpack.c.bf16 %v1227_v57, %v1223_v54 }
 0x1b8   : > { %v1231_v60 = vpop.eup %1230  ;;  %v614_v61 = vpack.c.bf16 %v1229_v58, %v1225_v56 }
 0x1b9   : > { %v1233_v62 = vpop.eup %1232  ;;  %v594_v63 = vadd.f32 1.0, %v1231_v60 }
 0x1ba   : > { %v1235_v0 = vpop.eup %1234  ;;  %v592_v1 = vadd.f32 1.0, %v1233_v62  ;;  %1063 = vmatprep.mubr.bf16.mxu1 %v614_v61 }
 0x1bb   : > { %v1237_v2 = vpop.eup %1236  ;;  %1246 = vrcp.f32 %v594_v63  ;;  %v595_v3 = vadd.f32 1.0, %v1235_v0  ;;  %1064 = vmatmul.mubr.bf16.gmra.mrb[4].mxu1 %v615_v59 }
 0x1bc   : > { %1248 = vrcp.f32 %v592_v1  ;;  %v593_v4 = vadd.f32 1.0, %v1237_v2 }
 0x1bd   : > { %v1239_v5 = vpop.eup %1238  ;;  %1250 = vrcp.f32 %v595_v3 }
 0x1be   : > { %v1241_v6 = vpop.eup %1240  ;;  %1252 = vrcp.f32 %v593_v4 }
 0x1bf   : > { %v1243_v7 = vpop.eup %1242 }
 0x1c0   : > { %v1245_v8 = vpop.eup %1244  ;;  %v617_v9 = vpack.c.bf16 %v1243_v7, %v1239_v5 }
 0x1c1   : > { %v616_v10 = vpack.c.bf16 %v1245_v8, %v1241_v6 }
 0x1c3   : > { %1067 = vmatprep.mubr.bf16.mxu1 %v616_v10 }
 0x1c4   : > { %1068 = vmatmul.mubr.bf16.gmra.mrb[8].mxu1 %v617_v9 }
 0x1c5   : > { %v1247_v11 = vpop.eup %1246 }
 0x1c6   : > { %v1249_v12 = vpop.eup %1248 }
 0x1c7   : > { %v1251_v13 = vpop.eup %1250 }
 0x1c8   : > { %v1253_v14 = vpop.eup %1252  ;;  %v619_v15 = vpack.c.bf16 %v1251_v13, %v1247_v11 }
 0x1c9   : > { %v618_v16 = vpack.c.bf16 %v1253_v14, %v1249_v12 }
 0x1cb   : > { %1071 = vmatprep.mubr.bf16.mxu1 %v618_v16 }
 0x1cc   : > { %1072 = vmatmul.mubr.bf16.gmra.mrb[12].mxu1 %v619_v15 }
 0x286   : > { %v1061_v18 = vpop.f32.mrb[0].mxu1 }
 0x287   : > { %v734_v19 = vadd.f32 %v1061_v18, %v963_v17  ;;  %v725_v20 = vpop.f32.mrb[1].mxu1 }
 0x288   : > { %v726_v21 = vadd.f32 %v963_v17, %v725_v20  ;;  %v1062_v22 = vpop.f32.mrb[2].mxu1 }
 0x289   : > { %790 = vst [vmem:[%s1777_s26 + $0x10] sm:$0xff] %v734_v19  ;;  %v737_v23 = vadd.f32 %v1062_v22, %v963_v17  ;;  %v728_v25 = vpop.f32.mrb[3].mxu1 }
 0x28a   : > { %788 = vst [vmem:[%s1777_s26] sm:$0xff] %v726_v21  ;;  %v729_v26 = vadd.f32 %v963_v17, %v728_v25 }
 0x28b   : > { %791 = vst [vmem:[%s1777_s26 + $0x18] sm:$0xff] %v737_v23 }
 0x28c   : > { %789 = vst [vmem:[%s1777_s26 + $0x8] sm:$0xff] %v729_v26 }
 0x28e   : > { %v1065_v27 = vpop.f32.mrb[4].mxu1 }
 0x28f   : > { %v750_v28 = vadd.f32 %v1065_v27, %v963_v17  ;;  %v741_v29 = vpop.f32.mrb[5].mxu1 }
 0x290   : > { %v742_v30 = vadd.f32 %v963_v17, %v741_v29  ;;  %v1066_v31 = vpop.f32.mrb[6].mxu1 }
 0x291   : > { %794 = vst [vmem:[%s1777_s26 + $0x30] sm:$0xff] %v750_v28  ;;  %v753_v32 = vadd.f32 %v1066_v31, %v963_v17  ;;  %v744_v33 = vpop.f32.mrb[7].mxu1 }
 0x292   : > { %792 = vst [vmem:[%s1777_s26 + $0x20] sm:$0xff] %v742_v30  ;;  %v745_v34 = vadd.f32 %v963_v17, %v744_v33 }
 0x293   : > { %795 = vst [vmem:[%s1777_s26 + $0x38] sm:$0xff] %v753_v32 }
 0x294   : > { %793 = vst [vmem:[%s1777_s26 + $0x28] sm:$0xff] %v745_v34 }
 0x297   : > { %v1069_v35 = vpop.f32.mrb[8].mxu1 }
 0x298   : > { %v766_v36 = vadd.f32 %v1069_v35, %v963_v17  ;;  %v757_v37 = vpop.f32.mrb[9].mxu1 }
 0x299   : > { %v758_v38 = vadd.f32 %v963_v17, %v757_v37  ;;  %v1070_v39 = vpop.f32.mrb[10].mxu1 }
 0x29a   : > { %798 = vst [vmem:[%s1777_s26 + $0x50] sm:$0xff] %v766_v36  ;;  %v769_v40 = vadd.f32 %v1070_v39, %v963_v17  ;;  %v760_v41 = vpop.f32.mrb[11].mxu1 }
 0x29b   : > { %796 = vst [vmem:[%s1777_s26 + $0x40] sm:$0xff] %v758_v38  ;;  %v761_v42 = vadd.f32 %v963_v17, %v760_v41 }
 0x29c   : > { %799 = vst [vmem:[%s1777_s26 + $0x58] sm:$0xff] %v769_v40 }
 0x29d   : > { %797 = vst [vmem:[%s1777_s26 + $0x48] sm:$0xff] %v761_v42 }
 0x29f   : > { %v1073_v43 = vpop.f32.mrb[12].mxu1 }
 0x2a0   : > { %v782_v44 = vadd.f32 %v1073_v43, %v963_v17  ;;  %v773_v45 = vpop.f32.mrb[13].mxu1 }
 0x2a1   : > { %v774_v46 = vadd.f32 %v963_v17, %v773_v45  ;;  %v1074_v47 = vpop.f32.mrb[14].mxu1 }
 0x2a2   : > { %802 = vst [vmem:[%s1777_s26 + $0x70] sm:$0xff] %v782_v44  ;;  %v785_v24 = vadd.f32 %v1074_v47, %v963_v17  ;;  %v776_v48 = vpop.f32.mrb[15].mxu1 }
 0x2a3   : > { %800 = vst [vmem:[%s1777_s26 + $0x60] sm:$0xff] %v774_v46  ;;  %v777_v49 = vadd.f32 %v963_v17, %v776_v48 }
 0x2a4   : > { %803 = vst [vmem:[%s1777_s26 + $0x78] sm:$0xff] %v785_v24 }
 0x2a5   : > { %801 = vst [vmem:[%s1777_s26 + $0x68] sm:$0xff] %v777_v49 }
 0x2a6   : > { %1409 = shalt.err (!%p1406_p13)
}
 0x2a7   : > { %s1410_s12 = scalar_lea.hbm %s1797_s28, 2048  ;;  %s1414_s15 = scalar_lea.hbm %s1851_s5, 4096 }
 0x2a8   : > { %p1411_p9 = scmp.ne.s32.totalorder %s1797_s28, %s1410_s12  ;;  %p1415_p6 = scmp.lt.u32.totalorder %s1797_s28, %s1851_s5 }
 0x2a9   : > { %p1416_p4 = scmp.lt.u32.totalorder %s1414_s15, %s1410_s12  ;;  %p1418_p3 = scmp.lt.u32.totalorder %s1410_s12, %s1797_s28 }
 0x2aa   : > { %p1412_p0 = pnand %p1411_p9, %p1677_p10 }
 0x2ab   : > { %p1417_p8 = por %p1416_p4, %p1415_p6 }
 0x2ac   : > { %p1413_p11 = pneg %p1412_p0 }
 0x2ad   : > { %p1419_p5 = por %p1418_p3, %p1417_p8 }
 0x2af   : > { %p1420_p7 = pnand %p1419_p5, %p1413_p11 }
 0x2b1   : > { %1423 = shalt.err (!%p1420_p7)
}
 0x2b2   : > { %s1480_s23 = smov 128   ;;  %s1481_s16 = smov 8  }
 0x2b3   : > { %1093 = dma.vmem_to_hbm [thread:$0]  (%p1677_p10), %s1799_s27, 2048, %s1797_s28, %s805_s22, %s1480_s23, %s1480_s23, %s1481_s16  }
 0x2b4 PF: > { %s833_s6 = sand.u32 1, %s1458_s18   ;;  %p1869_p12 = scmp.ne.s32.totalorder %s1856_s25, 0 }
 0x2b5   : > { %p1870_p1 = scmp.ge.s32.totalorder %s1470_s21, 2  ;;  %s834_s17 = scalar_lea.sflag [#allocation4], %s833_s6 }
 0x2b7   : > { %p1113_p2 = pnand %p1870_p1, %p1869_p12 }
 0x2b9   : > { %1453 = dma.done.wait (!%p1113_p2), %s834_s17, 2048  }
 0x2ba   : > { %1455 = vsyncadd (!%p1113_p2), %s834_s17, 4294965248  ;;  %p20_p13 = scmp.ge.s32.totalorder %s1667_s14, 4   ;;  %s1871_s18 = smov %s1462_s19 }
 0x2bb   : > { %s1872_s19 = smov %s1466_s20  ;;  %s1873_s20 = smov %s1683_s10 }
 0x2bc   : > { %s1874_s21 = smov %s1667_s14  ;;  %22 = sbr.rel (!%p20_p13) target bundleno = 7 (0x7), region = 101 }
 0x2c3   :  { %839 = vsyncpa [#allocation3], 1 }
 0x2c4   :  { %841 = vsyncpa [#allocation3 + $0x1], 1 }
 0x2c5   :  { %842 = vsyncpa [#allocation6], 1 }
 0x2c6   :  { %843 = vsyncpa [#allocation9], 1 }
 0x2c7   :  { %844 = vsyncpa [#allocation4], 1 }
 0x2c8   :  { %846 = vsyncpa [#allocation4 + $0x1], 1 }

</bundles_post_ra>
